<compile_context>
chip_gen: v7x
topology: tpu7x:2x2x1
jax: 0.10.0
libtpu: 0.0.40
codegen_flags: <defaults>
</compile_context>

<pallas_src>
import functools

import jax
import jax.numpy as jnp
from jax import lax
from jax.experimental import pallas as pl
from jax.experimental.pallas import tpu as pltpu


def lstm_classifier_kernel(tok_ref, proj_ref, whhfc_ref, fcb_ref, out_ref):
    """Whole forward pass in one kernel invocation.

    tok_ref   : (B, T)  int32 token ids, SMEM
    proj_ref  : (V, 1, 4H) f32  pre-folded  emb @ W_ih^T + (b_ih + b_hh)
    whhfc_ref : (H, 4H + Op)    [W_hh^T | W_fc^T (lane-padded)] in matmul dtype
    fcb_ref   : (1, Op) f32     FC bias, lane-padded
    out_ref   : (B, Op) f32     sigmoid(fc(h_T)); padded lanes sliced off by caller
    """
    B, T = tok_ref.shape
    H = whhfc_ref.shape[0]
    H4 = 4 * H
    cdt = whhfc_ref.dtype                    # MXU input dtype (bf16 default)

    whh_fc = whhfc_ref[...]                  # resident across the whole recurrence
    # TODO(synk): on v5e check the bundle dump; if Mosaic does not hoist the
    # loop-invariant RHS push, drive the MXU explicitly via matmul_push_rhs/acc/pop.

    def xproj(t):
        # In-kernel gather of pre-projected token rows (bias already folded in).
        rows = [proj_ref[tok_ref[b, t]] for b in range(B)]   # each (1, 4H) f32
        return jnp.concatenate(rows, axis=0)                 # (B, 4H) f32

    # h_0 = 0  =>  step-0 gates are just the gathered projection (no dot needed).
    gates = xproj(0)
    c = jnp.zeros((B, H), jnp.float32)
    res = jnp.zeros((B, whhfc_ref.shape[1]), jnp.float32)

    # T is small and static: fully unrolled recurrence inside one invocation.
    # TODO(synk): switch to lax.fori_loop carrying (h, c) if T grows beyond ~32
    # (static unroll does not bound vreg live ranges -> spills).
    for t in range(T):
        # Full-width transcendentals over the whole (B, 4H) tile, then 32-lane
        # slices.  Gate math stays f32 (v5e VPU/EUP have no bf16).
        sig = jax.nn.sigmoid(gates)
        tnh = jnp.tanh(gates)
        i_g = sig[:, 0 * H:1 * H]
        f_g = sig[:, 1 * H:2 * H]
        g_g = tnh[:, 2 * H:3 * H]
        o_g = sig[:, 3 * H:4 * H]
        c = f_g * c + i_g * g_g
        h = o_g * jnp.tanh(c)
        # One fused MXU pass per step: [h @ W_hh^T | h @ W_fc^T], f32 accumulation.
        res = jnp.dot(h.astype(cdt), whh_fc, preferred_element_type=jnp.float32)
        if t + 1 < T:
            gates = xproj(t + 1) + res[:, :H4]

    # res holds [h_T @ W_hh^T | h_T @ W_fc^T]; only the FC lanes are consumed.
    logits = res[:, H4:] + fcb_ref[...]
    out_ref[...] = jax.nn.sigmoid(logits).astype(out_ref.dtype)


def prepare_lstm_params(emb_table, w_ih, w_hh, b_ih, b_hh, fc_w, fc_b,
                        matmul_dtype=jnp.bfloat16):
    """One-time weight layout / fusion (hoisted out of the per-call path).

    Returns (proj_table, whh_fc, fcb_pad) ready to feed lstm_classifier_forward.
    matmul_dtype=bfloat16 (default, all TPU generations) keeps f32 accumulation;
    pass jnp.float32 for bit-tight parity with an f32 reference.
    """
    H = w_hh.shape[1]
    O = fc_w.shape[0]
    O_pad = max(128, -(-O // 128) * 128)        # lane-dense FC output

    bias = (b_ih + b_hh).astype(jnp.float32)                       # (4H,)
    # Frozen embedding folded into the input projection + fused bias: (V, 4H).
    proj = emb_table.astype(jnp.float32) @ w_ih.T.astype(jnp.float32) + bias[None, :]
    proj_table = proj[:, None, :]               # (V, 1, 4H): dynamically indexable rows

    whh_t = w_hh.T.astype(matmul_dtype)                            # (H, 4H)
    fcw_pad = jnp.pad(fc_w.T, ((0, 0), (0, O_pad - O))).astype(matmul_dtype)  # (H, Op)
    whh_fc = jnp.concatenate([whh_t, fcw_pad], axis=1)             # (H, 4H + Op)
    fcb_pad = jnp.pad(fc_b, (0, O_pad - O))[None, :].astype(jnp.float32)      # (1, Op)
    return proj_table, whh_fc, fcb_pad


@functools.partial(jax.jit, static_argnames=("out_dim",))
def lstm_classifier_forward(tokens, proj_table, whh_fc, fcb, *, out_dim):
    """tokens: (B, T) int32.  Returns sigmoid(fc(last LSTM hidden)) of shape (B, O)."""
    B, T = tokens.shape
    O_pad = fcb.shape[1]

    out = pl.pallas_call(
        lstm_classifier_kernel,
        out_shape=jax.ShapeDtypeStruct((B, O_pad), jnp.float32),
        in_specs=[
            pl.BlockSpec(memory_space=pltpu.MemorySpace.SMEM),   # token ids
            pl.BlockSpec(memory_space=pltpu.MemorySpace.VMEM),   # proj table
            pl.BlockSpec(memory_space=pltpu.MemorySpace.VMEM),   # [W_hh | W_fc]
            pl.BlockSpec(memory_space=pltpu.MemorySpace.VMEM),   # FC bias
        ],
        out_specs=pl.BlockSpec(memory_space=pltpu.MemorySpace.VMEM),
        # TODO(synk): for serving batches (B >= 16) add a leading grid axis over
        # batch tiles with dimension_semantics=("parallel",) so v7x's second
        # TensorCore runs an independent batch slice; moot at B=2.
        # TODO(synk): if T/B/E scale up, tile over T with BlockSpec +
        # pl.Buffered(2-3) instead of whole-array VMEM residency (v7x 64 MiB VMEM).
    )(tokens, proj_table, whh_fc, fcb)

    return out[:, :out_dim]


def reference_forward(tokens, emb_table, w_ih, w_hh, b_ih, b_hh, fc_w, fc_b):
    """Pure-JAX reference matching torch.nn.LSTM + Linear + Sigmoid semantics."""
    x = jnp.take(emb_table, tokens, axis=0)   # (B, T, E)
    B, T, E = x.shape
    H = w_hh.shape[1]

    def step(carry, x_t):
        h, c = carry
        gates = x_t @ w_ih.T + b_ih + h @ w_hh.T + b_hh
        i = jax.nn.sigmoid(gates[:, 0 * H:1 * H])
        f = jax.nn.sigmoid(gates[:, 1 * H:2 * H])
        g = jnp.tanh(gates[:, 2 * H:3 * H])
        o = jax.nn.sigmoid(gates[:, 3 * H:4 * H])
        c = f * c + i * g
        h = o * jnp.tanh(c)
        return (h, c), None

    h0 = jnp.zeros((B, H), jnp.float32)
    c0 = jnp.zeros((B, H), jnp.float32)
    (h_last, _), _ = lax.scan(step, (h0, c0), jnp.transpose(x, (1, 0, 2)))
    return jax.nn.sigmoid(h_last @ fc_w.T + fc_b)


if __name__ == "__main__":
    # Small shapes consistent with the module's forward.
    VOCAB = 20          # len(word2index); embedding table has VOCAB + 1 rows
    EMB = 16            # word2vec.vector_size
    HIDDEN = 32
    OUT = 4
    BATCH = 2
    SEQ = 8

    key = jax.random.PRNGKey(0)
    k_emb, k_wih, k_whh, k_bih, k_bhh, k_fcw, k_fcb, k_tok = jax.random.split(key, 8)

    # Deterministic "pretrained" embedding (frozen in the module) + LSTM/FC params.
    emb_table = jax.random.normal(k_emb, (VOCAB + 1, EMB), jnp.float32) * 0.1
    w_ih = jax.random.normal(k_wih, (4 * HIDDEN, EMB), jnp.float32) * 0.1
    w_hh = jax.random.normal(k_whh, (4 * HIDDEN, HIDDEN), jnp.float32) * 0.1
    b_ih = jax.random.normal(k_bih, (4 * HIDDEN,), jnp.float32) * 0.1
    b_hh = jax.random.normal(k_bhh, (4 * HIDDEN,), jnp.float32) * 0.1
    fc_w = jax.random.normal(k_fcw, (OUT, HIDDEN), jnp.float32) * 0.1
    fc_b = jax.random.normal(k_fcb, (OUT,), jnp.float32) * 0.1

    tokens = jax.random.randint(k_tok, (BATCH, SEQ), 0, VOCAB + 1, jnp.int32)

    ref = reference_forward(tokens, emb_table, w_ih, w_hh, b_ih, b_hh, fc_w, fc_b)

    # f32 matmul path: exact-parity check against the pure-JAX reference.
    params_f32 = prepare_lstm_params(emb_table, w_ih, w_hh, b_ih, b_hh, fc_w, fc_b,
                                     matmul_dtype=jnp.float32)
    out_f32 = lstm_classifier_forward(tokens, *params_f32, out_dim=OUT)
    out_f32 = jax.block_until_ready(out_f32)
    assert out_f32.shape == (BATCH, OUT)
    assert jnp.allclose(out_f32, ref, atol=1e-5, rtol=1e-5), (out_f32, ref)

    # Default bf16 matmul path (all generations): looser, bf16-level tolerance.
    params_bf16 = prepare_lstm_params(emb_table, w_ih, w_hh, b_ih, b_hh, fc_w, fc_b)
    out_bf16 = lstm_classifier_forward(tokens, *params_bf16, out_dim=OUT)
    out_bf16 = jax.block_until_ready(out_bf16)
    assert out_bf16.shape == (BATCH, OUT)
    assert jnp.allclose(out_bf16, ref, atol=3e-2, rtol=3e-2), (out_bf16, ref)

    print("KERNEL_OK")
</pallas_src>

<mosaic_0001>
module attributes {stable_mosaic.version = 11 : i64} {
  func.func @lstm_classifier_kernel(%arg0: memref<2x8xi32, #tpu.memory_space<smem>>, %arg1: memref<21x1x128xf32, #tpu.memory_space<vmem>>, %arg2: memref<32x256xf32, #tpu.memory_space<vmem>>, %arg3: memref<1x128xf32, #tpu.memory_space<vmem>>, %arg4: memref<2x128xf32, #tpu.memory_space<vmem>>) attributes {dimension_semantics = [], scalar_prefetch = 0 : i64, scratch_operands = 0 : i64, tpu.core_type = #tpu.core_type<tc>} {
    %c0 = arith.constant 0 : index
    %c0_0 = arith.constant 0 : index
    %0 = vector.load %arg2[%c0, %c0_0] : memref<32x256xf32, #tpu.memory_space<vmem>>, vector<32x256xf32>
    %c0_1 = arith.constant 0 : index
    %c0_2 = arith.constant 0 : index
    %1 = memref.load %arg0[%c0_1, %c0_2] : memref<2x8xi32, #tpu.memory_space<smem>>
    %2 = arith.index_cast %1 : i32 to index
    %c0_3 = arith.constant 0 : index
    %c0_4 = arith.constant 0 : index
    %3 = vector.load %arg1[%2, %c0_3, %c0_4] : memref<21x1x128xf32, #tpu.memory_space<vmem>>, vector<1x1x128xf32>
    %4 = vector.shape_cast %3 : vector<1x1x128xf32> to vector<1x128xf32>
    %c1 = arith.constant 1 : index
    %c0_5 = arith.constant 0 : index
    %5 = memref.load %arg0[%c1, %c0_5] : memref<2x8xi32, #tpu.memory_space<smem>>
    %6 = arith.index_cast %5 : i32 to index
    %c0_6 = arith.constant 0 : index
    %c0_7 = arith.constant 0 : index
    %7 = vector.load %arg1[%6, %c0_6, %c0_7] : memref<21x1x128xf32, #tpu.memory_space<vmem>>, vector<1x1x128xf32>
    %8 = vector.shape_cast %7 : vector<1x1x128xf32> to vector<1x128xf32>
    %9 = tpu.concatenate %4, %8 in 0 : vector<1x128xf32>, vector<1x128xf32> -> vector<2x128xf32>
    %cst = arith.constant 0.000000e+00 : f32
    %10 = vector.broadcast %cst : f32 to vector<2x32xf32>
    %11 = arith.negf %9 : vector<2x128xf32>
    %12 = math.exp %11 : vector<2x128xf32>
    %cst_8 = arith.constant 1.000000e+00 : f32
    %13 = vector.broadcast %cst_8 : f32 to vector<2x128xf32>
    %14 = arith.addf %13, %12 : vector<2x128xf32>
    %15 = arith.divf %13, %14 : vector<2x128xf32>
    %16 = math.tanh %9 : vector<2x128xf32>
    %17 = vector.extract_strided_slice %15 {offsets = [0, 0], sizes = [2, 32], strides = [1, 1]} : vector<2x128xf32> to vector<2x32xf32>
    %18 = vector.extract_strided_slice %15 {offsets = [0, 32], sizes = [2, 32], strides = [1, 1]} : vector<2x128xf32> to vector<2x32xf32>
    %19 = vector.extract_strided_slice %16 {offsets = [0, 64], sizes = [2, 32], strides = [1, 1]} : vector<2x128xf32> to vector<2x32xf32>
    %20 = vector.extract_strided_slice %15 {offsets = [0, 96], sizes = [2, 32], strides = [1, 1]} : vector<2x128xf32> to vector<2x32xf32>
    %21 = arith.mulf %18, %10 : vector<2x32xf32>
    %22 = arith.mulf %17, %19 : vector<2x32xf32>
    %23 = arith.addf %21, %22 : vector<2x32xf32>
    %24 = math.tanh %23 : vector<2x32xf32>
    %25 = arith.mulf %20, %24 : vector<2x32xf32>
    %cst_9 = arith.constant dense<0.000000e+00> : vector<2x256xf32>
    %26 = tpu.matmul %25, %0, %cst_9 {dimension_numbers = #tpu.dot_dimension_numbers<[1], [0], [0], [1], [0, 0, 1, 1], [], []>} : vector<2x32xf32>, vector<32x256xf32>, vector<2x256xf32> -> vector<2x256xf32>
    %c0_10 = arith.constant 0 : index
    %c1_11 = arith.constant 1 : index
    %27 = memref.load %arg0[%c0_10, %c1_11] : memref<2x8xi32, #tpu.memory_space<smem>>
    %28 = arith.index_cast %27 : i32 to index
    %c0_12 = arith.constant 0 : index
    %c0_13 = arith.constant 0 : index
    %29 = vector.load %arg1[%28, %c0_12, %c0_13] : memref<21x1x128xf32, #tpu.memory_space<vmem>>, vector<1x1x128xf32>
    %30 = vector.shape_cast %29 : vector<1x1x128xf32> to vector<1x128xf32>
    %c1_14 = arith.constant 1 : index
    %c1_15 = arith.constant 1 : index
    %31 = memref.load %arg0[%c1_14, %c1_15] : memref<2x8xi32, #tpu.memory_space<smem>>
    %32 = arith.index_cast %31 : i32 to index
    %c0_16 = arith.constant 0 : index
    %c0_17 = arith.constant 0 : index
    %33 = vector.load %arg1[%32, %c0_16, %c0_17] : memref<21x1x128xf32, #tpu.memory_space<vmem>>, vector<1x1x128xf32>
    %34 = vector.shape_cast %33 : vector<1x1x128xf32> to vector<1x128xf32>
    %35 = tpu.concatenate %30, %34 in 0 : vector<1x128xf32>, vector<1x128xf32> -> vector<2x128xf32>
    %36 = vector.extract_strided_slice %26 {offsets = [0, 0], sizes = [2, 128], strides = [1, 1]} : vector<2x256xf32> to vector<2x128xf32>
    %37 = arith.addf %35, %36 : vector<2x128xf32>
    %38 = arith.negf %37 : vector<2x128xf32>
    %39 = math.exp %38 : vector<2x128xf32>
    %cst_18 = arith.constant 1.000000e+00 : f32
    %40 = vector.broadcast %cst_18 : f32 to vector<2x128xf32>
    %41 = arith.addf %40, %39 : vector<2x128xf32>
    %42 = arith.divf %40, %41 : vector<2x128xf32>
    %43 = math.tanh %37 : vector<2x128xf32>
    %44 = vector.extract_strided_slice %42 {offsets = [0, 0], sizes = [2, 32], strides = [1, 1]} : vector<2x128xf32> to vector<2x32xf32>
    %45 = vector.extract_strided_slice %42 {offsets = [0, 32], sizes = [2, 32], strides = [1, 1]} : vector<2x128xf32> to vector<2x32xf32>
    %46 = vector.extract_strided_slice %43 {offsets = [0, 64], sizes = [2, 32], strides = [1, 1]} : vector<2x128xf32> to vector<2x32xf32>
    %47 = vector.extract_strided_slice %42 {offsets = [0, 96], sizes = [2, 32], strides = [1, 1]} : vector<2x128xf32> to vector<2x32xf32>
    %48 = arith.mulf %45, %23 : vector<2x32xf32>
    %49 = arith.mulf %44, %46 : vector<2x32xf32>
    %50 = arith.addf %48, %49 : vector<2x32xf32>
    %51 = math.tanh %50 : vector<2x32xf32>
    %52 = arith.mulf %47, %51 : vector<2x32xf32>
    %cst_19 = arith.constant dense<0.000000e+00> : vector<2x256xf32>
    %53 = tpu.matmul %52, %0, %cst_19 {dimension_numbers = #tpu.dot_dimension_numbers<[1], [0], [0], [1], [0, 0, 1, 1], [], []>} : vector<2x32xf32>, vector<32x256xf32>, vector<2x256xf32> -> vector<2x256xf32>
    %c0_20 = arith.constant 0 : index
    %c2 = arith.constant 2 : index
    %54 = memref.load %arg0[%c0_20, %c2] : memref<2x8xi32, #tpu.memory_space<smem>>
    %55 = arith.index_cast %54 : i32 to index
    %c0_21 = arith.constant 0 : index
    %c0_22 = arith.constant 0 : index
    %56 = vector.load %arg1[%55, %c0_21, %c0_22] : memref<21x1x128xf32, #tpu.memory_space<vmem>>, vector<1x1x128xf32>
    %57 = vector.shape_cast %56 : vector<1x1x128xf32> to vector<1x128xf32>
    %c1_23 = arith.constant 1 : index
    %c2_24 = arith.constant 2 : index
    %58 = memref.load %arg0[%c1_23, %c2_24] : memref<2x8xi32, #tpu.memory_space<smem>>
    %59 = arith.index_cast %58 : i32 to index
    %c0_25 = arith.constant 0 : index
    %c0_26 = arith.constant 0 : index
    %60 = vector.load %arg1[%59, %c0_25, %c0_26] : memref<21x1x128xf32, #tpu.memory_space<vmem>>, vector<1x1x128xf32>
    %61 = vector.shape_cast %60 : vector<1x1x128xf32> to vector<1x128xf32>
    %62 = tpu.concatenate %57, %61 in 0 : vector<1x128xf32>, vector<1x128xf32> -> vector<2x128xf32>
    %63 = vector.extract_strided_slice %53 {offsets = [0, 0], sizes = [2, 128], strides = [1, 1]} : vector<2x256xf32> to vector<2x128xf32>
    %64 = arith.addf %62, %63 : vector<2x128xf32>
    %65 = arith.negf %64 : vector<2x128xf32>
    %66 = math.exp %65 : vector<2x128xf32>
    %cst_27 = arith.constant 1.000000e+00 : f32
    %67 = vector.broadcast %cst_27 : f32 to vector<2x128xf32>
    %68 = arith.addf %67, %66 : vector<2x128xf32>
    %69 = arith.divf %67, %68 : vector<2x128xf32>
    %70 = math.tanh %64 : vector<2x128xf32>
    %71 = vector.extract_strided_slice %69 {offsets = [0, 0], sizes = [2, 32], strides = [1, 1]} : vector<2x128xf32> to vector<2x32xf32>
    %72 = vector.extract_strided_slice %69 {offsets = [0, 32], sizes = [2, 32], strides = [1, 1]} : vector<2x128xf32> to vector<2x32xf32>
    %73 = vector.extract_strided_slice %70 {offsets = [0, 64], sizes = [2, 32], strides = [1, 1]} : vector<2x128xf32> to vector<2x32xf32>
    %74 = vector.extract_strided_slice %69 {offsets = [0, 96], sizes = [2, 32], strides = [1, 1]} : vector<2x128xf32> to vector<2x32xf32>
    %75 = arith.mulf %72, %50 : vector<2x32xf32>
    %76 = arith.mulf %71, %73 : vector<2x32xf32>
    %77 = arith.addf %75, %76 : vector<2x32xf32>
    %78 = math.tanh %77 : vector<2x32xf32>
    %79 = arith.mulf %74, %78 : vector<2x32xf32>
    %cst_28 = arith.constant dense<0.000000e+00> : vector<2x256xf32>
    %80 = tpu.matmul %79, %0, %cst_28 {dimension_numbers = #tpu.dot_dimension_numbers<[1], [0], [0], [1], [0, 0, 1, 1], [], []>} : vector<2x32xf32>, vector<32x256xf32>, vector<2x256xf32> -> vector<2x256xf32>
    %c0_29 = arith.constant 0 : index
    %c3 = arith.constant 3 : index
    %81 = memref.load %arg0[%c0_29, %c3] : memref<2x8xi32, #tpu.memory_space<smem>>
    %82 = arith.index_cast %81 : i32 to index
    %c0_30 = arith.constant 0 : index
    %c0_31 = arith.constant 0 : index
    %83 = vector.load %arg1[%82, %c0_30, %c0_31] : memref<21x1x128xf32, #tpu.memory_space<vmem>>, vector<1x1x128xf32>
    %84 = vector.shape_cast %83 : vector<1x1x128xf32> to vector<1x128xf32>
    %c1_32 = arith.constant 1 : index
    %c3_33 = arith.constant 3 : index
    %85 = memref.load %arg0[%c1_32, %c3_33] : memref<2x8xi32, #tpu.memory_space<smem>>
    %86 = arith.index_cast %85 : i32 to index
    %c0_34 = arith.constant 0 : index
    %c0_35 = arith.constant 0 : index
    %87 = vector.load %arg1[%86, %c0_34, %c0_35] : memref<21x1x128xf32, #tpu.memory_space<vmem>>, vector<1x1x128xf32>
    %88 = vector.shape_cast %87 : vector<1x1x128xf32> to vector<1x128xf32>
    %89 = tpu.concatenate %84, %88 in 0 : vector<1x128xf32>, vector<1x128xf32> -> vector<2x128xf32>
    %90 = vector.extract_strided_slice %80 {offsets = [0, 0], sizes = [2, 128], strides = [1, 1]} : vector<2x256xf32> to vector<2x128xf32>
    %91 = arith.addf %89, %90 : vector<2x128xf32>
    %92 = arith.negf %91 : vector<2x128xf32>
    %93 = math.exp %92 : vector<2x128xf32>
    %cst_36 = arith.constant 1.000000e+00 : f32
    %94 = vector.broadcast %cst_36 : f32 to vector<2x128xf32>
    %95 = arith.addf %94, %93 : vector<2x128xf32>
    %96 = arith.divf %94, %95 : vector<2x128xf32>
    %97 = math.tanh %91 : vector<2x128xf32>
    %98 = vector.extract_strided_slice %96 {offsets = [0, 0], sizes = [2, 32], strides = [1, 1]} : vector<2x128xf32> to vector<2x32xf32>
    %99 = vector.extract_strided_slice %96 {offsets = [0, 32], sizes = [2, 32], strides = [1, 1]} : vector<2x128xf32> to vector<2x32xf32>
    %100 = vector.extract_strided_slice %97 {offsets = [0, 64], sizes = [2, 32], strides = [1, 1]} : vector<2x128xf32> to vector<2x32xf32>
    %101 = vector.extract_strided_slice %96 {offsets = [0, 96], sizes = [2, 32], strides = [1, 1]} : vector<2x128xf32> to vector<2x32xf32>
    %102 = arith.mulf %99, %77 : vector<2x32xf32>
    %103 = arith.mulf %98, %100 : vector<2x32xf32>
    %104 = arith.addf %102, %103 : vector<2x32xf32>
    %105 = math.tanh %104 : vector<2x32xf32>
    %106 = arith.mulf %101, %105 : vector<2x32xf32>
    %cst_37 = arith.constant dense<0.000000e+00> : vector<2x256xf32>
    %107 = tpu.matmul %106, %0, %cst_37 {dimension_numbers = #tpu.dot_dimension_numbers<[1], [0], [0], [1], [0, 0, 1, 1], [], []>} : vector<2x32xf32>, vector<32x256xf32>, vector<2x256xf32> -> vector<2x256xf32>
    %c0_38 = arith.constant 0 : index
    %c4 = arith.constant 4 : index
    %108 = memref.load %arg0[%c0_38, %c4] : memref<2x8xi32, #tpu.memory_space<smem>>
    %109 = arith.index_cast %108 : i32 to index
    %c0_39 = arith.constant 0 : index
    %c0_40 = arith.constant 0 : index
    %110 = vector.load %arg1[%109, %c0_39, %c0_40] : memref<21x1x128xf32, #tpu.memory_space<vmem>>, vector<1x1x128xf32>
    %111 = vector.shape_cast %110 : vector<1x1x128xf32> to vector<1x128xf32>
    %c1_41 = arith.constant 1 : index
    %c4_42 = arith.constant 4 : index
    %112 = memref.load %arg0[%c1_41, %c4_42] : memref<2x8xi32, #tpu.memory_space<smem>>
    %113 = arith.index_cast %112 : i32 to index
    %c0_43 = arith.constant 0 : index
    %c0_44 = arith.constant 0 : index
    %114 = vector.load %arg1[%113, %c0_43, %c0_44] : memref<21x1x128xf32, #tpu.memory_space<vmem>>, vector<1x1x128xf32>
    %115 = vector.shape_cast %114 : vector<1x1x128xf32> to vector<1x128xf32>
    %116 = tpu.concatenate %111, %115 in 0 : vector<1x128xf32>, vector<1x128xf32> -> vector<2x128xf32>
    %117 = vector.extract_strided_slice %107 {offsets = [0, 0], sizes = [2, 128], strides = [1, 1]} : vector<2x256xf32> to vector<2x128xf32>
    %118 = arith.addf %116, %117 : vector<2x128xf32>
    %119 = arith.negf %118 : vector<2x128xf32>
    %120 = math.exp %119 : vector<2x128xf32>
    %cst_45 = arith.constant 1.000000e+00 : f32
    %121 = vector.broadcast %cst_45 : f32 to vector<2x128xf32>
    %122 = arith.addf %121, %120 : vector<2x128xf32>
    %123 = arith.divf %121, %122 : vector<2x128xf32>
    %124 = math.tanh %118 : vector<2x128xf32>
    %125 = vector.extract_strided_slice %123 {offsets = [0, 0], sizes = [2, 32], strides = [1, 1]} : vector<2x128xf32> to vector<2x32xf32>
    %126 = vector.extract_strided_slice %123 {offsets = [0, 32], sizes = [2, 32], strides = [1, 1]} : vector<2x128xf32> to vector<2x32xf32>
    %127 = vector.extract_strided_slice %124 {offsets = [0, 64], sizes = [2, 32], strides = [1, 1]} : vector<2x128xf32> to vector<2x32xf32>
    %128 = vector.extract_strided_slice %123 {offsets = [0, 96], sizes = [2, 32], strides = [1, 1]} : vector<2x128xf32> to vector<2x32xf32>
    %129 = arith.mulf %126, %104 : vector<2x32xf32>
    %130 = arith.mulf %125, %127 : vector<2x32xf32>
    %131 = arith.addf %129, %130 : vector<2x32xf32>
    %132 = math.tanh %131 : vector<2x32xf32>
    %133 = arith.mulf %128, %132 : vector<2x32xf32>
    %cst_46 = arith.constant dense<0.000000e+00> : vector<2x256xf32>
    %134 = tpu.matmul %133, %0, %cst_46 {dimension_numbers = #tpu.dot_dimension_numbers<[1], [0], [0], [1], [0, 0, 1, 1], [], []>} : vector<2x32xf32>, vector<32x256xf32>, vector<2x256xf32> -> vector<2x256xf32>
    %c0_47 = arith.constant 0 : index
    %c5 = arith.constant 5 : index
    %135 = memref.load %arg0[%c0_47, %c5] : memref<2x8xi32, #tpu.memory_space<smem>>
    %136 = arith.index_cast %135 : i32 to index
    %c0_48 = arith.constant 0 : index
    %c0_49 = arith.constant 0 : index
    %137 = vector.load %arg1[%136, %c0_48, %c0_49] : memref<21x1x128xf32, #tpu.memory_space<vmem>>, vector<1x1x128xf32>
    %138 = vector.shape_cast %137 : vector<1x1x128xf32> to vector<1x128xf32>
    %c1_50 = arith.constant 1 : index
    %c5_51 = arith.constant 5 : index
    %139 = memref.load %arg0[%c1_50, %c5_51] : memref<2x8xi32, #tpu.memory_space<smem>>
    %140 = arith.index_cast %139 : i32 to index
    %c0_52 = arith.constant 0 : index
    %c0_53 = arith.constant 0 : index
    %141 = vector.load %arg1[%140, %c0_52, %c0_53] : memref<21x1x128xf32, #tpu.memory_space<vmem>>, vector<1x1x128xf32>
    %142 = vector.shape_cast %141 : vector<1x1x128xf32> to vector<1x128xf32>
    %143 = tpu.concatenate %138, %142 in 0 : vector<1x128xf32>, vector<1x128xf32> -> vector<2x128xf32>
    %144 = vector.extract_strided_slice %134 {offsets = [0, 0], sizes = [2, 128], strides = [1, 1]} : vector<2x256xf32> to vector<2x128xf32>
    %145 = arith.addf %143, %144 : vector<2x128xf32>
    %146 = arith.negf %145 : vector<2x128xf32>
    %147 = math.exp %146 : vector<2x128xf32>
    %cst_54 = arith.constant 1.000000e+00 : f32
    %148 = vector.broadcast %cst_54 : f32 to vector<2x128xf32>
    %149 = arith.addf %148, %147 : vector<2x128xf32>
    %150 = arith.divf %148, %149 : vector<2x128xf32>
    %151 = math.tanh %145 : vector<2x128xf32>
    %152 = vector.extract_strided_slice %150 {offsets = [0, 0], sizes = [2, 32], strides = [1, 1]} : vector<2x128xf32> to vector<2x32xf32>
    %153 = vector.extract_strided_slice %150 {offsets = [0, 32], sizes = [2, 32], strides = [1, 1]} : vector<2x128xf32> to vector<2x32xf32>
    %154 = vector.extract_strided_slice %151 {offsets = [0, 64], sizes = [2, 32], strides = [1, 1]} : vector<2x128xf32> to vector<2x32xf32>
    %155 = vector.extract_strided_slice %150 {offsets = [0, 96], sizes = [2, 32], strides = [1, 1]} : vector<2x128xf32> to vector<2x32xf32>
    %156 = arith.mulf %153, %131 : vector<2x32xf32>
    %157 = arith.mulf %152, %154 : vector<2x32xf32>
    %158 = arith.addf %156, %157 : vector<2x32xf32>
    %159 = math.tanh %158 : vector<2x32xf32>
    %160 = arith.mulf %155, %159 : vector<2x32xf32>
    %cst_55 = arith.constant dense<0.000000e+00> : vector<2x256xf32>
    %161 = tpu.matmul %160, %0, %cst_55 {dimension_numbers = #tpu.dot_dimension_numbers<[1], [0], [0], [1], [0, 0, 1, 1], [], []>} : vector<2x32xf32>, vector<32x256xf32>, vector<2x256xf32> -> vector<2x256xf32>
    %c0_56 = arith.constant 0 : index
    %c6 = arith.constant 6 : index
    %162 = memref.load %arg0[%c0_56, %c6] : memref<2x8xi32, #tpu.memory_space<smem>>
    %163 = arith.index_cast %162 : i32 to index
    %c0_57 = arith.constant 0 : index
    %c0_58 = arith.constant 0 : index
    %164 = vector.load %arg1[%163, %c0_57, %c0_58] : memref<21x1x128xf32, #tpu.memory_space<vmem>>, vector<1x1x128xf32>
    %165 = vector.shape_cast %164 : vector<1x1x128xf32> to vector<1x128xf32>
    %c1_59 = arith.constant 1 : index
    %c6_60 = arith.constant 6 : index
    %166 = memref.load %arg0[%c1_59, %c6_60] : memref<2x8xi32, #tpu.memory_space<smem>>
    %167 = arith.index_cast %166 : i32 to index
    %c0_61 = arith.constant 0 : index
    %c0_62 = arith.constant 0 : index
    %168 = vector.load %arg1[%167, %c0_61, %c0_62] : memref<21x1x128xf32, #tpu.memory_space<vmem>>, vector<1x1x128xf32>
    %169 = vector.shape_cast %168 : vector<1x1x128xf32> to vector<1x128xf32>
    %170 = tpu.concatenate %165, %169 in 0 : vector<1x128xf32>, vector<1x128xf32> -> vector<2x128xf32>
    %171 = vector.extract_strided_slice %161 {offsets = [0, 0], sizes = [2, 128], strides = [1, 1]} : vector<2x256xf32> to vector<2x128xf32>
    %172 = arith.addf %170, %171 : vector<2x128xf32>
    %173 = arith.negf %172 : vector<2x128xf32>
    %174 = math.exp %173 : vector<2x128xf32>
    %cst_63 = arith.constant 1.000000e+00 : f32
    %175 = vector.broadcast %cst_63 : f32 to vector<2x128xf32>
    %176 = arith.addf %175, %174 : vector<2x128xf32>
    %177 = arith.divf %175, %176 : vector<2x128xf32>
    %178 = math.tanh %172 : vector<2x128xf32>
    %179 = vector.extract_strided_slice %177 {offsets = [0, 0], sizes = [2, 32], strides = [1, 1]} : vector<2x128xf32> to vector<2x32xf32>
    %180 = vector.extract_strided_slice %177 {offsets = [0, 32], sizes = [2, 32], strides = [1, 1]} : vector<2x128xf32> to vector<2x32xf32>
    %181 = vector.extract_strided_slice %178 {offsets = [0, 64], sizes = [2, 32], strides = [1, 1]} : vector<2x128xf32> to vector<2x32xf32>
    %182 = vector.extract_strided_slice %177 {offsets = [0, 96], sizes = [2, 32], strides = [1, 1]} : vector<2x128xf32> to vector<2x32xf32>
    %183 = arith.mulf %180, %158 : vector<2x32xf32>
    %184 = arith.mulf %179, %181 : vector<2x32xf32>
    %185 = arith.addf %183, %184 : vector<2x32xf32>
    %186 = math.tanh %185 : vector<2x32xf32>
    %187 = arith.mulf %182, %186 : vector<2x32xf32>
    %cst_64 = arith.constant dense<0.000000e+00> : vector<2x256xf32>
    %188 = tpu.matmul %187, %0, %cst_64 {dimension_numbers = #tpu.dot_dimension_numbers<[1], [0], [0], [1], [0, 0, 1, 1], [], []>} : vector<2x32xf32>, vector<32x256xf32>, vector<2x256xf32> -> vector<2x256xf32>
    %c0_65 = arith.constant 0 : index
    %c7 = arith.constant 7 : index
    %189 = memref.load %arg0[%c0_65, %c7] : memref<2x8xi32, #tpu.memory_space<smem>>
    %190 = arith.index_cast %189 : i32 to index
    %c0_66 = arith.constant 0 : index
    %c0_67 = arith.constant 0 : index
    %191 = vector.load %arg1[%190, %c0_66, %c0_67] : memref<21x1x128xf32, #tpu.memory_space<vmem>>, vector<1x1x128xf32>
    %192 = vector.shape_cast %191 : vector<1x1x128xf32> to vector<1x128xf32>
    %c1_68 = arith.constant 1 : index
    %c7_69 = arith.constant 7 : index
    %193 = memref.load %arg0[%c1_68, %c7_69] : memref<2x8xi32, #tpu.memory_space<smem>>
    %194 = arith.index_cast %193 : i32 to index
    %c0_70 = arith.constant 0 : index
    %c0_71 = arith.constant 0 : index
    %195 = vector.load %arg1[%194, %c0_70, %c0_71] : memref<21x1x128xf32, #tpu.memory_space<vmem>>, vector<1x1x128xf32>
    %196 = vector.shape_cast %195 : vector<1x1x128xf32> to vector<1x128xf32>
    %197 = tpu.concatenate %192, %196 in 0 : vector<1x128xf32>, vector<1x128xf32> -> vector<2x128xf32>
    %198 = vector.extract_strided_slice %188 {offsets = [0, 0], sizes = [2, 128], strides = [1, 1]} : vector<2x256xf32> to vector<2x128xf32>
    %199 = arith.addf %197, %198 : vector<2x128xf32>
    %200 = arith.negf %199 : vector<2x128xf32>
    %201 = math.exp %200 : vector<2x128xf32>
    %cst_72 = arith.constant 1.000000e+00 : f32
    %202 = vector.broadcast %cst_72 : f32 to vector<2x128xf32>
    %203 = arith.addf %202, %201 : vector<2x128xf32>
    %204 = arith.divf %202, %203 : vector<2x128xf32>
    %205 = math.tanh %199 : vector<2x128xf32>
    %206 = vector.extract_strided_slice %204 {offsets = [0, 0], sizes = [2, 32], strides = [1, 1]} : vector<2x128xf32> to vector<2x32xf32>
    %207 = vector.extract_strided_slice %204 {offsets = [0, 32], sizes = [2, 32], strides = [1, 1]} : vector<2x128xf32> to vector<2x32xf32>
    %208 = vector.extract_strided_slice %205 {offsets = [0, 64], sizes = [2, 32], strides = [1, 1]} : vector<2x128xf32> to vector<2x32xf32>
    %209 = vector.extract_strided_slice %204 {offsets = [0, 96], sizes = [2, 32], strides = [1, 1]} : vector<2x128xf32> to vector<2x32xf32>
    %210 = arith.mulf %207, %185 : vector<2x32xf32>
    %211 = arith.mulf %206, %208 : vector<2x32xf32>
    %212 = arith.addf %210, %211 : vector<2x32xf32>
    %213 = math.tanh %212 : vector<2x32xf32>
    %214 = arith.mulf %209, %213 : vector<2x32xf32>
    %cst_73 = arith.constant dense<0.000000e+00> : vector<2x256xf32>
    %215 = tpu.matmul %214, %0, %cst_73 {dimension_numbers = #tpu.dot_dimension_numbers<[1], [0], [0], [1], [0, 0, 1, 1], [], []>} : vector<2x32xf32>, vector<32x256xf32>, vector<2x256xf32> -> vector<2x256xf32>
    %216 = vector.extract_strided_slice %215 {offsets = [0, 128], sizes = [2, 128], strides = [1, 1]} : vector<2x256xf32> to vector<2x128xf32>
    %c0_74 = arith.constant 0 : index
    %c0_75 = arith.constant 0 : index
    %217 = vector.load %arg3[%c0_74, %c0_75] : memref<1x128xf32, #tpu.memory_space<vmem>>, vector<1x128xf32>
    %218 = vector.broadcast %217 : vector<1x128xf32> to vector<2x128xf32>
    %219 = arith.addf %216, %218 : vector<2x128xf32>
    %220 = arith.negf %219 : vector<2x128xf32>
    %221 = math.exp %220 : vector<2x128xf32>
    %cst_76 = arith.constant 1.000000e+00 : f32
    %222 = vector.broadcast %cst_76 : f32 to vector<2x128xf32>
    %223 = arith.addf %222, %221 : vector<2x128xf32>
    %224 = arith.divf %222, %223 : vector<2x128xf32>
    %c0_77 = arith.constant 0 : index
    %c0_78 = arith.constant 0 : index
    %225 = vector.load %arg4[%c0_77, %c0_78] : memref<2x128xf32, #tpu.memory_space<vmem>>, vector<2x128xf32>
    tpu.vector_store %arg4[%c0_77, %c0_78], %224 {strides = array<i32>} : memref<2x128xf32, #tpu.memory_space<vmem>>, vector<2x128xf32>,
    return
  }
}

</mosaic_0001>

<bundles_post_ra>
// kernel: lstm_classifier_forward.1
= control target key start
LH: loop header
LB: loop body
LE: loop exit
PB: predicated region body
PF: predicated region fallthrough
CT: control target
= control target key end

     0   :  { %9 = vsyncpa [#allocation5], 0  ;;  %s1467_s0 = inlined_call_operand.hbm [shape: s32[2,8], index: 0, kind: input, shape index: {}]   ;;  %s1468_s1 = inlined_call_operand.hbm [shape: f32[21,1,128], index: 1, kind: input, shape index: {}]   ;;  %s1469_s2 = inlined_call_operand.hbm [shape: f32[32,256], index: 2, kind: input, shape index: {}]   ;;  %s1470_s3 = inlined_call_operand.vmem [shape: f32[1,128], index: 3, kind: input, shape index: {}]   ;;  %s1471_s4 = inlined_call_operand.hbm [shape: f32[2,128], index: 4, kind: output, shape index: {}]  }
   0x1   :  { %10 = vsyncpa [#allocation3], 0 }
   0x2   :  { %11 = vsyncpa [#allocation8], 0 }
   0x3   :  { %12 = vsyncpa [#allocation4], 0  ;;  %s1201_s17 = scalar_lea.hbm %s1467_s0, 32 }
   0x4   :  { %p1202_p0 = scmp.ne.s32.totalorder %s1467_s0, %s1201_s17  ;;  %p1205_p1 = scmp.lt.u32.totalorder %s1201_s17, %s1467_s0 }
   0x6   :  { %p1207_p2 = pnand %p1205_p1, %p1202_p0 }
   0x8   :  { %1210 = shalt.err (!%p1207_p2)
}
   0x9   :  { %s1285_s22 = smov [#allocation2]   ;;  %s1286_s25 = smov [#allocation6]  }
   0xa   :  { %20 = dma.hbm_to_smem %s1467_s0, 32, %s1285_s22, [#allocation5]  }
   0xb   :  { %s26_s26 = sshll.u32 %s1286_s25, 4  ;;  %s1211_s29 = scalar_lea.hbm %s1468_s1, 336  ;;  %s27_s26 = int_to_ptr.vmem [resolvable:$true] %s26_s26 }
   0xc   :  { %p1212_p3 = scmp.ne.s32.totalorder %s1468_s1, %s1211_s29  ;;  %p1215_p4 = scmp.lt.u32.totalorder %s1211_s29, %s1468_s1 }
   0xe   :  { %p1217_p5 = pnand %p1215_p4, %p1212_p3 }
  0x10   :  { %1220 = shalt.err (!%p1217_p5)
}
  0x11   :  { %s1221_s8 = scalar_lea.vmem %s27_s26, 336  ;;  %s1225_s0 = scalar_lea.vmem %s27_s26, 352 }
  0x12   :  { %p1222_p6 = scmp.ne.s32.totalorder %s27_s26, %s1221_s8  ;;  %p1226_p7 = scmp.lt.s32.totalorder %s27_s26, %s27_s26 }
  0x13   :  { %p1227_p8 = scmp.lt.s32.totalorder %s1225_s0, %s1221_s8 }
  0x15   :  { %p1228_p9 = por %p1227_p8, %p1226_p7 }
  0x17   :  { %p1229_p10 = pnand %p1228_p9, %p1222_p6 }
  0x19   :  { %1232 = shalt.err (!%p1229_p10)
}
  0x1a   :  { %s1287_s9 = smov 16   ;;  %s1288_s10 = smov 1  }
  0x1b   :  { %32 = dma.hbm_to_vmem [thread:$0]  %s1468_s1, 336, %s27_s26, [#allocation3], %s1287_s9, %s1287_s9, %s1288_s10  }
  0x1c   :  { %s1289_s13 = smov [#allocation7]   ;;  %s1233_s17 = scalar_lea.hbm %s1469_s2, 1024 }
  0x1d   :  { %s38_s14 = sshll.u32 %s1289_s13, 4  ;;  %p1234_p11 = scmp.ne.s32.totalorder %s1469_s2, %s1233_s17  ;;  %s39_s14 = int_to_ptr.vmem [resolvable:$true] %s38_s14 }
  0x1e   :  { %p1237_p12 = scmp.lt.u32.totalorder %s1233_s17, %s1469_s2 }
  0x20   :  { %p1239_p13 = pnand %p1237_p12, %p1234_p11 }
  0x22   :  { %1242 = shalt.err (!%p1239_p13)
}
  0x23   :  { %s1243_s22 = scalar_lea.vmem %s39_s14, 1024  ;;  %p1248_p1 = scmp.lt.s32.totalorder %s39_s14, %s39_s14 }
  0x24   :  { %p1244_p0 = scmp.ne.s32.totalorder %s39_s14, %s1243_s22  ;;  %p1249_p2 = scmp.lt.s32.totalorder %s1243_s22, %s1243_s22 }
  0x26   :  { %p1250_p3 = por %p1249_p2, %p1248_p1 }
  0x28   :  { %p1251_p4 = pnand %p1250_p3, %p1244_p0 }
  0x2a   :  { %1254 = shalt.err (!%p1251_p4)
}
  0x2b   :  { %s1290_s1 = smov 256  }
  0x2c   :  { %44 = dma.hbm_to_vmem [thread:$0]  %s1469_s2, 1024, %s39_s14, [#allocation8], %s1290_s1, %s1290_s1, %s1287_s9  }
  0x2d   :  { %1277 = dma.done.wait [#allocation5], 32  }
  0x2e   :  { %1278 = vsyncadd [#allocation5], 4294967264 }
  0x2f   :  { %1279 = dma.done.wait [#allocation3], 336  }
  0x30   :  { %1280 = vsyncadd [#allocation3], 4294966960 }
  0x31   :  { %1281 = dma.done.wait [#allocation8], 1024  }
  0x32   :  { %1282 = vsyncadd [#allocation8], 4294966272 }
  0x33   :  { %56 = sfence }
  0x34   :  { %s65_s25 = sld [smem:[#allocation2]]  ;;  %vm77_vm0 = vcmask 1040384   ;;  %s1291_s29 = smov 64   ;;  %v58_v13 = vld [vmem:[#allocation7 + $0x8] sm:$0xff]  ;;  %v60_v14 = vld [vmem:[#allocation7 + $0x18] sm:$0xff]  ;;  %v57_v15 = vld [vmem:[#allocation7] sm:$0xff] }
  0x35   :  { %s1018_s26 = sld [smem:[#allocation2 + $0x80]]  ;;  %s1292_s2 = smov 32   ;;  %v1359_v16 = vpack.c.bf16 %v60_v14, %v58_v13  ;;  %v59_v17 = vld [vmem:[#allocation7 + $0x10] sm:$0xff]  ;;  %v62_v18 = vld [vmem:[#allocation7 + $0x28] sm:$0xff]  ;;  %v64_v19 = vld [vmem:[#allocation7 + $0x38] sm:$0xff]  ;;  %v1293_v20 = vmov 0.0  }
  0x36   :  { %173 = vmatprep.mubr.f32.mxu0 %v1293_v20  ;;  %286 = vmatprep.mubr.f32.mxu1 %v1293_v20  ;;  %v1363_v21 = vpack.c.bf16 %v59_v17, %v57_v15  ;;  %v1365_v22 = vpack.c.bf16 %v64_v19, %v62_v18  ;;  %v61_v23 = vld [vmem:[#allocation7 + $0x20] sm:$0xff]  ;;  %v63_v24 = vld [vmem:[#allocation7 + $0x30] sm:$0xff]  ;;  %vm106_vm1 = vcmask 261120   ;;  %s1022_s30 = sld [smem:[#allocation2 + $0x1]]  ;;  %s1027_s8 = sld [smem:[#allocation2 + $0x2]] }
  0x37   :  { %1060 = vmatprep.subr.bf16.mxu0 %v1359_v16  ;;  %1068 = vmatprep.subr.bf16.mxu1 %v1359_v16  ;;  %v1370_v25 = vpack.c.bf16 %v63_v24, %v61_v23  ;;  %s1023_s5 = sld [smem:[#allocation2 + $0x81]]  ;;  %s1028_s0 = sld [smem:[#allocation2 + $0x82]] }
  0x38   :  { %1062 = vmatpush1.bf16.msra.mxu0 %v1363_v21  ;;  %1070 = vmatpush1.bf16.msra.mxu1 %v1363_v21  ;;  %s1032_s11 = sld [smem:[#allocation2 + $0x3]]  ;;  %s1037_s15 = sld [smem:[#allocation2 + $0x4]] }
  0x39   :  { %1064 = vmatprep.subr.bf16.mxu0 %v1365_v22  ;;  %1072 = vmatprep.subr.bf16.mxu1 %v1365_v22  ;;  %s1033_s12 = sld [smem:[#allocation2 + $0x83]]  ;;  %s1038_s16 = sld [smem:[#allocation2 + $0x84]] }
  0x3a   :  { %s66_s27 = scalar_lea.vmem [#allocation6], %s65_s25  ;;  %s1042_s19 = sld [smem:[#allocation2 + $0x5]] }
  0x3b   :  { %v67_v0 = vld [vmem:[%s66_s27] sm:$0x1]  ;;  %s69_s28 = scalar_lea.vmem [#allocation6], %s1018_s26  ;;  %s1043_s20 = sld [smem:[#allocation2 + $0x85]] }
  0x3c   :  { %v1019_v1 = vld [vmem:[%s69_s28] ss:$0 sm:$0xff]  ;;  %1066 = vmatpush1.bf16.msra.mxu0 %v1370_v25  ;;  %1074 = vmatpush1.bf16.msra.mxu1 %v1370_v25  ;;  %s180_s6 = scalar_lea.vmem [#allocation6], %s1022_s30  ;;  %s293_s9 = scalar_lea.vmem [#allocation6], %s1027_s8 }
  0x3d   :  { %v78_v2 = vsel %vm77_vm0, %v67_v0, %v1019_v1  ;;  %1076 = vmatprep.subr.bf16.mxu0 %v1359_v16  ;;  %1084 = vmatprep.subr.bf16.mxu1 %v1359_v16  ;;  %v181_v30 = vld [vmem:[%s180_s6] sm:$0x1]  ;;  %s183_s7 = scalar_lea.vmem [#allocation6], %s1023_s5  ;;  %s296_s10 = scalar_lea.vmem [#allocation6], %s1028_s0 }
  0x3e   :  { %1133 = vtanh.f32 %v78_v2  ;;  %v1020_v4 = vmul.f32 -1.442695, %v78_v2  ;;  %v1024_v31 = vld [vmem:[%s183_s7] ss:$0 sm:$0xff]  ;;  %s406_s13 = scalar_lea.vmem [#allocation6], %s1032_s11  ;;  %s519_s17 = scalar_lea.vmem [#allocation6], %s1037_s15 }
  0x3f   :  { %v191_v32 = vsel %vm77_vm0, %v181_v30, %v1024_v31  ;;  %v294_v50 = vld [vmem:[%s293_s9] sm:$0x1]  ;;  %s409_s14 = scalar_lea.vmem [#allocation6], %s1033_s12  ;;  %s522_s18 = scalar_lea.vmem [#allocation6], %s1038_s16 }
  0x40   :  { %1135 = vpow2.f32 %v1020_v4  ;;  %v1029_v51 = vld [vmem:[%s296_s10] ss:$0 sm:$0xff]  ;;  %s632_s21 = scalar_lea.vmem [#allocation6], %s1042_s19  ;;  %s1047_s1 = sld [smem:[#allocation2 + $0x6]] }
  0x41   :  { %v304_v52 = vsel %vm77_vm0, %v294_v50, %v1029_v51  ;;  %v520_v31 = vld [vmem:[%s519_s17] sm:$0x1]  ;;  %s635_s22 = scalar_lea.vmem [#allocation6], %s1043_s20  ;;  %s1048_s23 = sld [smem:[#allocation2 + $0x86]] }
  0x42   :  { %v633_v50 = vld [vmem:[%s632_s21] sm:$0x1]  ;;  %s1052_s26 = sld [smem:[#allocation2 + $0x7]] }
  0x43   :  { %v1044_v51 = vld [vmem:[%s635_s22] ss:$0 sm:$0xff]  ;;  %s1053_s27 = sld [smem:[#allocation2 + $0x87]] }
  0x46   :  { %s745_s24 = scalar_lea.vmem [#allocation6], %s1047_s1 }
  0x47   :  { %s748_s25 = scalar_lea.vmem [#allocation6], %s1048_s23 }
  0x48   :  { %v1134_v3 = vpop.eup %1133  ;;  %s858_s28 = scalar_lea.vmem [#allocation6], %s1052_s26 }
  0x49   :  { %88 = vrot.lane.b32.xlu0 %v1134_v3, %s1291_s29  ;;  %s861_s30 = scalar_lea.vmem [#allocation6], %s1053_s27 }
  0x4a   :  { %v1136_v5 = vpop.eup %1135 }
  0x4b   :  { %v82_v6 = vadd.f32 1.0, %v1136_v5 }
  0x4d   :  { %1137 = vrcp.f32 %v82_v6  ;;  %v407_v6 = vld [vmem:[%s406_s13] sm:$0x1] }
  0x57   :  { %v1138_v7 = vpop.eup %1137 }
  0x58   :  { %v86_v10 = vmul.f32 0.0, %v1138_v7 }
  0xbb   :  { %v89_v8 = vpop.permute.xlu0 %88 }
  0xbc   :  { %v91_v9 = vmul.f32 %v1138_v7, %v89_v8 }
  0xbe   :  { %93 = vrot.lane.b32.xlu0 %v91_v9, %s1292_s2 }
 0x130   :  { %v94_v11 = vpop.permute.xlu0 %93 }
 0x131   :  { %v96_v12 = vadd.f32 %v94_v11, %v86_v10 }
 0x133   :  { %1139 = vtanh.f32 %v96_v12 }
 0x13d   :  { %v1140_v26 = vpop.eup %1139 }
 0x13e   :  { %99 = vrot.lane.b32.xlu1 %v1140_v26, %s1291_s29 }
 0x1b0   :  { %v100_v27 = vpop.permute.xlu1 %99 }
 0x1b1   :  { %v102_v28 = vmul.f32 %v1138_v7, %v100_v27  ;;  %v1034_v7 = vld [vmem:[%s409_s14] ss:$0 sm:$0xff] }
 0x1b2   :  { %v417_v8 = vsel %vm77_vm0, %v407_v6, %v1034_v7  ;;  %v746_v6 = vld [vmem:[%s745_s24] sm:$0x1] }
 0x1b3   :  { %104 = vrot.lane.b32.xlu1 %v102_v28, %s1292_s2  ;;  %v1049_v7 = vld [vmem:[%s748_s25] ss:$0 sm:$0xff] }
 0x225   :  { %v105_v29 = vpop.permute.xlu1 %104 }
 0x226   :  { %1021 = vmatmul.mubr.msk.f32.vlgmr.msra.gmra.mrb[0].mxu0 %vm106_vm1, %v105_v29 }
 0x227   :  { %1078 = vmatpush1.bf16.msra.mxu0 %v1363_v21  ;;  %399 = vmatprep.mubr.f32.mxu0 %v1293_v20 }
 0x228   :  { %1080 = vmatprep.subr.bf16.mxu0 %v1365_v22 }
 0x22b   :  { %1082 = vmatpush1.bf16.msra.mxu0 %v1370_v25 }
 0x22c   :  { %1092 = vmatprep.subr.bf16.mxu0 %v1359_v16 }
 0x2f9   :  { %v175_v33 = vpop.f32.mrb[0].mxu0 }
 0x2fa   :  { %v192_v34 = vadd.f32 %v191_v32, %v175_v33  ;;  %v177_v35 = vpop.f32.mrb[1].mxu0  ;;  %v1039_v32 = vld [vmem:[%s522_s18] ss:$0 sm:$0xff] }
 0x2fb   :  { %v530_v33 = vsel %vm77_vm0, %v520_v31, %v1039_v32 }
 0x2fc   :  { %1141 = vtanh.f32 %v192_v34  ;;  %v1025_v37 = vmul.f32 -1.442695, %v192_v34 }
 0x2fe   :  { %1143 = vpow2.f32 %v1025_v37 }
 0x306   :  { %v1142_v36 = vpop.eup %1141 }
 0x307   :  { %202 = vrot.lane.b32.xlu0 %v1142_v36, %s1291_s29 }
 0x308   :  { %v1144_v38 = vpop.eup %1143 }
 0x309   :  { %v196_v39 = vadd.f32 1.0, %v1144_v38 }
 0x30b   :  { %1145 = vrcp.f32 %v196_v39 }
 0x315   :  { %v1146_v40 = vpop.eup %1145 }
 0x316   :  { %v200_v43 = vmul.f32 %v1146_v40, %v96_v12 }
 0x379   :  { %v203_v41 = vpop.permute.xlu0 %202 }
 0x37a   :  { %v205_v42 = vmul.f32 %v1146_v40, %v203_v41 }
 0x37c   :  { %207 = vrot.lane.b32.xlu1 %v205_v42, %s1292_s2 }
 0x3ee   :  { %v208_v44 = vpop.permute.xlu1 %207 }
 0x3ef   :  { %v210_v45 = vadd.f32 %v208_v44, %v200_v43 }
 0x3f1   :  { %1147 = vtanh.f32 %v210_v45 }
 0x3fb   :  { %v1148_v46 = vpop.eup %1147 }
 0x3fc   :  { %213 = vrot.lane.b32.xlu0 %v1148_v46, %s1291_s29 }
 0x46e   :  { %v214_v47 = vpop.permute.xlu0 %213 }
 0x46f   :  { %v216_v48 = vmul.f32 %v1146_v40, %v214_v47 }
 0x471   :  { %218 = vrot.lane.b32.xlu1 %v216_v48, %s1292_s2 }
 0x4e3   :  { %v219_v49 = vpop.permute.xlu1 %218 }
 0x4e4   :  { %1026 = vmatmul.mubr.msk.f32.vlgmr.msra.gmra.mrb[0].mxu1 %vm106_vm1, %v219_v49 }
 0x4e5   :  { %1086 = vmatpush1.bf16.msra.mxu1 %v1363_v21  ;;  %512 = vmatprep.mubr.f32.mxu1 %v1293_v20 }
 0x4e6   :  { %1088 = vmatprep.subr.bf16.mxu1 %v1365_v22 }
 0x4e9   :  { %1090 = vmatpush1.bf16.msra.mxu1 %v1370_v25 }
 0x4ea   :  { %1100 = vmatprep.subr.bf16.mxu1 %v1359_v16 }
 0x5b7   :  { %v288_v53 = vpop.f32.mrb[0].mxu1 }
 0x5b8   :  { %v305_v54 = vadd.f32 %v304_v52, %v288_v53  ;;  %v290_v55 = vpop.f32.mrb[1].mxu1  ;;  %v643_v52 = vsel %vm77_vm0, %v633_v50, %v1044_v51 }
 0x5ba   :  { %1149 = vtanh.f32 %v305_v54  ;;  %v1030_v57 = vmul.f32 -1.442695, %v305_v54 }
 0x5bc   :  { %1151 = vpow2.f32 %v1030_v57 }
 0x5c4   :  { %v1150_v56 = vpop.eup %1149 }
 0x5c5   :  { %315 = vrot.lane.b32.xlu0 %v1150_v56, %s1291_s29 }
 0x5c6   :  { %v1152_v58 = vpop.eup %1151 }
 0x5c7   :  { %v309_v59 = vadd.f32 1.0, %v1152_v58 }
 0x5c9   :  { %1153 = vrcp.f32 %v309_v59 }
 0x5d3   :  { %v1154_v60 = vpop.eup %1153 }
 0x5d4   :  { %v313_v63 = vmul.f32 %v1154_v60, %v210_v45 }
 0x637   :  { %v316_v61 = vpop.permute.xlu0 %315 }
 0x638   :  { %v318_v62 = vmul.f32 %v1154_v60, %v316_v61 }
 0x63a   :  { %320 = vrot.lane.b32.xlu1 %v318_v62, %s1292_s2 }
 0x6ac   :  { %v321_v0 = vpop.permute.xlu1 %320 }
 0x6ad   :  { %v323_v1 = vadd.f32 %v321_v0, %v313_v63 }
 0x6af   :  { %1155 = vtanh.f32 %v323_v1 }
 0x6b9   :  { %v1156_v2 = vpop.eup %1155 }
 0x6ba   :  { %326 = vrot.lane.b32.xlu0 %v1156_v2, %s1291_s29 }
 0x72c   :  { %v327_v3 = vpop.permute.xlu0 %326 }
 0x72d   :  { %v329_v4 = vmul.f32 %v1154_v60, %v327_v3 }
 0x72f   :  { %331 = vrot.lane.b32.xlu1 %v329_v4, %s1292_s2 }
 0x7a1   :  { %v332_v5 = vpop.permute.xlu1 %331 }
 0x7a2   :  { %1031 = vmatmul.mubr.msk.f32.vlgmr.msra.gmra.mrb[2].mxu0 %vm106_vm1, %v332_v5 }
 0x7a3   :  { %1094 = vmatpush1.bf16.msra.mxu0 %v1363_v21  ;;  %625 = vmatprep.mubr.f32.mxu0 %v1293_v20 }
 0x7a4   :  { %1096 = vmatprep.subr.bf16.mxu0 %v1365_v22 }
 0x7a7   :  { %1098 = vmatpush1.bf16.msra.mxu0 %v1370_v25 }
 0x7a8   :  { %1108 = vmatprep.subr.bf16.mxu0 %v1359_v16 }
 0x875   :  { %v401_v9 = vpop.f32.mrb[2].mxu0 }
 0x876   :  { %v418_v10 = vadd.f32 %v417_v8, %v401_v9  ;;  %v403_v11 = vpop.f32.mrb[3].mxu0  ;;  %v756_v8 = vsel %vm77_vm0, %v746_v6, %v1049_v7 }
 0x878   :  { %1157 = vtanh.f32 %v418_v10  ;;  %v1035_v13 = vmul.f32 -1.442695, %v418_v10 }
 0x87a   :  { %1159 = vpow2.f32 %v1035_v13 }
 0x882   :  { %v1158_v12 = vpop.eup %1157 }
 0x883   :  { %428 = vrot.lane.b32.xlu0 %v1158_v12, %s1291_s29 }
 0x884   :  { %v1160_v14 = vpop.eup %1159 }
 0x885   :  { %v422_v15 = vadd.f32 1.0, %v1160_v14 }
 0x887   :  { %1161 = vrcp.f32 %v422_v15 }
 0x891   :  { %v1162_v17 = vpop.eup %1161 }
 0x892   :  { %v426_v23 = vmul.f32 %v1162_v17, %v323_v1 }
 0x8f5   :  { %v429_v18 = vpop.permute.xlu0 %428 }
 0x8f6   :  { %v431_v19 = vmul.f32 %v1162_v17, %v429_v18 }
 0x8f8   :  { %433 = vrot.lane.b32.xlu1 %v431_v19, %s1292_s2 }
 0x96a   :  { %v434_v24 = vpop.permute.xlu1 %433 }
 0x96b   :  { %v436_v26 = vadd.f32 %v434_v24, %v426_v23 }
 0x96d   :  { %1163 = vtanh.f32 %v436_v26 }
 0x977   :  { %v1164_v27 = vpop.eup %1163 }
 0x978   :  { %439 = vrot.lane.b32.xlu0 %v1164_v27, %s1291_s29  ;;  %v859_v27 = vld [vmem:[%s858_s28] sm:$0x1] }
 0x9ea   :  { %v440_v28 = vpop.permute.xlu0 %439 }
 0x9eb   :  { %v442_v29 = vmul.f32 %v1162_v17, %v440_v28  ;;  %v1054_v28 = vld [vmem:[%s861_s30] ss:$0 sm:$0xff] }
 0x9ed   :  { %444 = vrot.lane.b32.xlu1 %v442_v29, %s1292_s2  ;;  %v869_v29 = vsel %vm77_vm0, %v859_v27, %v1054_v28 }
 0xa5f   :  { %v445_v30 = vpop.permute.xlu1 %444 }
 0xa60   :  { %1036 = vmatmul.mubr.msk.f32.vlgmr.msra.gmra.mrb[2].mxu1 %vm106_vm1, %v445_v30 }
 0xa61   :  { %1102 = vmatpush1.bf16.msra.mxu1 %v1363_v21  ;;  %738 = vmatprep.mubr.f32.mxu1 %v1293_v20 }
 0xa62   :  { %1104 = vmatprep.subr.bf16.mxu1 %v1365_v22 }
 0xa65   :  { %1106 = vmatpush1.bf16.msra.mxu1 %v1370_v25 }
 0xa66   :  { %1116 = vmatprep.subr.bf16.mxu1 %v1359_v16 }
 0xb33   :  { %v514_v34 = vpop.f32.mrb[2].mxu1 }
 0xb34   :  { %v531_v35 = vadd.f32 %v530_v33, %v514_v34  ;;  %v516_v36 = vpop.f32.mrb[3].mxu1 }
 0xb36   :  { %1165 = vtanh.f32 %v531_v35  ;;  %v1040_v38 = vmul.f32 -1.442695, %v531_v35 }
 0xb38   :  { %1167 = vpow2.f32 %v1040_v38 }
 0xb40   :  { %v1166_v37 = vpop.eup %1165 }
 0xb41   :  { %541 = vrot.lane.b32.xlu0 %v1166_v37, %s1291_s29 }
 0xb42   :  { %v1168_v39 = vpop.eup %1167 }
 0xb43   :  { %v535_v40 = vadd.f32 1.0, %v1168_v39 }
 0xb45   :  { %1169 = vrcp.f32 %v535_v40 }
 0xb4f   :  { %v1170_v16 = vpop.eup %1169 }
 0xb50   :  { %v539_v43 = vmul.f32 %v1170_v16, %v436_v26 }
 0xbb3   :  { %v542_v41 = vpop.permute.xlu0 %541 }
 0xbb4   :  { %v544_v42 = vmul.f32 %v1170_v16, %v542_v41 }
 0xbb6   :  { %546 = vrot.lane.b32.xlu1 %v544_v42, %s1292_s2 }
 0xc28   :  { %v547_v44 = vpop.permute.xlu1 %546 }
 0xc29   :  { %v549_v45 = vadd.f32 %v547_v44, %v539_v43 }
 0xc2b   :  { %1171 = vtanh.f32 %v549_v45 }
 0xc35   :  { %v1172_v46 = vpop.eup %1171 }
 0xc36   :  { %552 = vrot.lane.b32.xlu0 %v1172_v46, %s1291_s29  ;;  %v1057_v46 = vld [vmem:[%s1470_s3] ss:$0 sm:$0xff] }
 0xca8   :  { %v553_v47 = vpop.permute.xlu0 %552 }
 0xca9   :  { %v555_v48 = vmul.f32 %v1170_v16, %v553_v47 }
 0xcab   :  { %557 = vrot.lane.b32.xlu1 %v555_v48, %s1292_s2 }
 0xd1d   :  { %v558_v49 = vpop.permute.xlu1 %557 }
 0xd1e   :  { %1041 = vmatmul.mubr.msk.f32.vlgmr.msra.gmra.mrb[4].mxu0 %vm106_vm1, %v558_v49 }
 0xd1f   :  { %1110 = vmatpush1.bf16.msra.mxu0 %v1363_v21  ;;  %851 = vmatprep.mubr.f32.mxu0 %v1293_v20 }
 0xd20   :  { %1112 = vmatprep.subr.bf16.mxu0 %v1365_v22 }
 0xd23   :  { %1114 = vmatpush1.bf16.msra.mxu0 %v1370_v25 }
 0xdf1   :  { %v627_v53 = vpop.f32.mrb[4].mxu0 }
 0xdf2   :  { %v644_v54 = vadd.f32 %v643_v52, %v627_v53  ;;  %v629_v55 = vpop.f32.mrb[5].mxu0 }
 0xdf4   :  { %1173 = vtanh.f32 %v644_v54  ;;  %v1045_v57 = vmul.f32 -1.442695, %v644_v54 }
 0xdf6   :  { %1175 = vpow2.f32 %v1045_v57 }
 0xdfe   :  { %v1174_v56 = vpop.eup %1173 }
 0xdff   :  { %654 = vrot.lane.b32.xlu0 %v1174_v56, %s1291_s29 }
 0xe00   :  { %v1176_v58 = vpop.eup %1175 }
 0xe01   :  { %v648_v59 = vadd.f32 1.0, %v1176_v58 }
 0xe03   :  { %1177 = vrcp.f32 %v648_v59 }
 0xe0d   :  { %v1178_v60 = vpop.eup %1177 }
 0xe0e   :  { %v652_v63 = vmul.f32 %v1178_v60, %v549_v45 }
 0xe71   :  { %v655_v61 = vpop.permute.xlu0 %654 }
 0xe72   :  { %v657_v62 = vmul.f32 %v1178_v60, %v655_v61 }
 0xe74   :  { %659 = vrot.lane.b32.xlu1 %v657_v62, %s1292_s2 }
 0xee6   :  { %v660_v0 = vpop.permute.xlu1 %659 }
 0xee7   :  { %v662_v1 = vadd.f32 %v660_v0, %v652_v63 }
 0xee9   :  { %1179 = vtanh.f32 %v662_v1 }
 0xef3   :  { %v1180_v2 = vpop.eup %1179 }
 0xef4   :  { %665 = vrot.lane.b32.xlu0 %v1180_v2, %s1291_s29 }
 0xf66   :  { %v666_v3 = vpop.permute.xlu0 %665 }
 0xf67   :  { %v668_v4 = vmul.f32 %v1178_v60, %v666_v3 }
 0xf69   :  { %670 = vrot.lane.b32.xlu1 %v668_v4, %s1292_s2 }
 0xfdb   :  { %v671_v5 = vpop.permute.xlu1 %670 }
 0xfdc   :  { %1046 = vmatmul.mubr.msk.f32.vlgmr.msra.gmra.mrb[4].mxu1 %vm106_vm1, %v671_v5 }
 0xfdd   :  { %1118 = vmatpush1.bf16.msra.mxu1 %v1363_v21  ;;  %964 = vmatprep.mubr.f32.mxu1 %v1293_v20 }
 0xfde   :  { %1120 = vmatprep.subr.bf16.mxu1 %v1365_v22 }
 0xfe1   :  { %1122 = vmatpush1.bf16.msra.mxu1 %v1370_v25 }
0x10af   :  { %v740_v9 = vpop.f32.mrb[4].mxu1 }
0x10b0   :  { %v757_v10 = vadd.f32 %v756_v8, %v740_v9  ;;  %v742_v11 = vpop.f32.mrb[5].mxu1 }
0x10b2   :  { %1181 = vtanh.f32 %v757_v10  ;;  %v1050_v20 = vmul.f32 -1.442695, %v757_v10 }
0x10b4   :  { %1183 = vpow2.f32 %v1050_v20 }
0x10bc   :  { %v1182_v12 = vpop.eup %1181 }
0x10bd   :  { %767 = vrot.lane.b32.xlu0 %v1182_v12, %s1291_s29 }
0x10be   :  { %v1184_v21 = vpop.eup %1183 }
0x10bf   :  { %v761_v22 = vadd.f32 1.0, %v1184_v21 }
0x10c1   :  { %1185 = vrcp.f32 %v761_v22 }
0x10cb   :  { %v1186_v25 = vpop.eup %1185 }
0x10cc   :  { %v765_v15 = vmul.f32 %v1186_v25, %v662_v1 }
0x112f   :  { %v768_v13 = vpop.permute.xlu0 %767 }
0x1130   :  { %v770_v14 = vmul.f32 %v1186_v25, %v768_v13 }
0x1132   :  { %772 = vrot.lane.b32.xlu1 %v770_v14, %s1292_s2 }
0x11a4   :  { %v773_v17 = vpop.permute.xlu1 %772 }
0x11a5   :  { %v775_v18 = vadd.f32 %v773_v17, %v765_v15 }
0x11a7   :  { %1187 = vtanh.f32 %v775_v18 }
0x11b1   :  { %v1188_v19 = vpop.eup %1187 }
0x11b2   :  { %778 = vrot.lane.b32.xlu0 %v1188_v19, %s1291_s29 }
0x1224   :  { %v779_v23 = vpop.permute.xlu0 %778 }
0x1225   :  { %v781_v24 = vmul.f32 %v1186_v25, %v779_v23 }
0x1227   :  { %783 = vrot.lane.b32.xlu1 %v781_v24, %s1292_s2 }
0x1299   :  { %v784_v26 = vpop.permute.xlu1 %783 }
0x129a   :  { %1051 = vmatmul.mubr.msk.f32.vlgmr.msra.gmra.mrb[6].mxu0 %vm106_vm1, %v784_v26 }
0x136d   :  { %v853_v30 = vpop.f32.mrb[6].mxu0 }
0x136e   :  { %v870_v31 = vadd.f32 %v869_v29, %v853_v30  ;;  %v855_v32 = vpop.f32.mrb[7].mxu0 }
0x1370   :  { %1189 = vtanh.f32 %v870_v31  ;;  %v1055_v34 = vmul.f32 -1.442695, %v870_v31 }
0x1372   :  { %1191 = vpow2.f32 %v1055_v34 }
0x137a   :  { %v1190_v33 = vpop.eup %1189 }
0x137b   :  { %880 = vrot.lane.b32.xlu0 %v1190_v33, %s1291_s29 }
0x137c   :  { %v1192_v35 = vpop.eup %1191 }
0x137d   :  { %v874_v36 = vadd.f32 1.0, %v1192_v35 }
0x137f   :  { %1193 = vrcp.f32 %v874_v36 }
0x1389   :  { %v1194_v37 = vpop.eup %1193 }
0x138a   :  { %v878_v40 = vmul.f32 %v1194_v37, %v775_v18 }
0x13ed   :  { %v881_v38 = vpop.permute.xlu0 %880 }
0x13ee   :  { %v883_v39 = vmul.f32 %v1194_v37, %v881_v38 }
0x13f0   :  { %885 = vrot.lane.b32.xlu1 %v883_v39, %s1292_s2 }
0x1462   :  { %v886_v16 = vpop.permute.xlu1 %885 }
0x1463   :  { %v888_v41 = vadd.f32 %v886_v16, %v878_v40 }
0x1465   :  { %1195 = vtanh.f32 %v888_v41 }
0x146f   :  { %v1196_v42 = vpop.eup %1195 }
0x1470   :  { %891 = vrot.lane.b32.xlu0 %v1196_v42, %s1291_s29  ;;  %s1294_s29 = smov [#allocation9]  }
0x1471   :  { %s991_s7 = sshll.u32 %s1294_s29, 4  ;;  %s992_s7 = int_to_ptr.vmem [resolvable:$true] %s991_s7 }
0x1472   :  { %p1260_p6 = scmp.lt.s32.totalorder %s992_s7, %s992_s7 }
0x14e2   :  { %v892_v43 = vpop.permute.xlu0 %891 }
0x14e3   :  { %v894_v44 = vmul.f32 %v1194_v37, %v892_v43 }
0x14e5   :  { %896 = vrot.lane.b32.xlu1 %v894_v44, %s1292_s2  ;;  %s1255_s2 = scalar_lea.vmem %s992_s7, 32 }
0x14e6   :  { %p1256_p5 = scmp.ne.s32.totalorder %s992_s7, %s1255_s2  ;;  %p1261_p7 = scmp.lt.s32.totalorder %s1255_s2, %s1255_s2 }
0x14e8   :  { %p1262_p8 = por %p1261_p7, %p1260_p6 }
0x14ea   :  { %p1263_p9 = pnand %p1262_p8, %p1256_p5 }
0x1557   :  { %v897_v45 = vpop.permute.xlu1 %896 }
0x1558   :  { %1056 = vmatmul.mubr.msk.f32.vlgmr.msra.gmra.mrb[6].mxu1 %vm106_vm1, %v897_v45 }
0x162b   :  { %v966_v47 = vpop.f32.mrb[6].mxu1 }
0x162c   :  { %v967_v48 = vpop.f32.mrb[7].mxu1 }
0x162d   :  { %v977_v49 = vadd.f32 %v1057_v46, %v967_v48 }
0x162f   :  { %v1058_v50 = vmul.f32 -1.442695, %v977_v49 }
0x1631   :  { %1197 = vpow2.f32 %v1058_v50 }
0x163b   :  { %v1198_v51 = vpop.eup %1197 }
0x163c   :  { %v981_v52 = vadd.f32 1.0, %v1198_v51 }
0x163e   :  { %1199 = vrcp.f32 %v981_v52 }
0x1648   :  { %v1200_v53 = vpop.eup %1199 }
0x1649   :  { %984 = vst [vmem:[#allocation9] sm:$0x3] %v1200_v53 }
0x164a   :  { %1266 = shalt.err (!%p1263_p9)
}
0x164b   :  { %s1267_s0 = scalar_lea.hbm %s1471_s4, 32 }
0x164c   :  { %p1268_p10 = scmp.ne.s32.totalorder %s1471_s4, %s1267_s0  ;;  %p1271_p11 = scmp.lt.u32.totalorder %s1267_s0, %s1471_s4 }
0x164e   :  { %p1273_p12 = pnand %p1271_p11, %p1268_p10 }
0x1650   :  { %1276 = shalt.err (!%p1273_p12)
}
0x1651   :  { %994 = dma.vmem_to_hbm [thread:$0]  %s992_s7, 32, %s1471_s4, [#allocation4]  }
0x1652   :  { %1283 = dma.done.wait [#allocation4], 32  }
0x1653   :  { %1284 = vsyncadd [#allocation4], 4294967264 }
0x1654   :  { %998 = vsyncpa [#allocation3], 1 }
0x1655   :  { %999 = vsyncpa [#allocation8], 1 }
0x1656   :  { %1000 = vsyncpa [#allocation4], 1 }
0x1657   :  { %1001 = vsyncpa [#allocation5], 1 }

</bundles_post_ra>
